<compile_context>
chip_gen: v6e
topology: v6e:2x2x1
jax: 0.10.0
libtpu: 0.0.40
codegen_flags: <defaults>
</compile_context>

<pallas_src>
import functools
import math

import jax
import jax.numpy as jnp
from jax.experimental import pallas as pl
from jax.experimental.pallas import tpu as pltpu

HIDDEN = 32     # hidden channel width of the synthetic unet
EMB_DIM = 16    # sinusoidal timestep-embedding width


# ---------------------------------------------------------------------------
# Fused kernel: conv3x3 (im2col matmul) + bias + FiLM + SiLU -> conv3x3
# (im2col matmul) + bias, all in a padded-flat channel-major layout.
# One grid step per batch element.
# ---------------------------------------------------------------------------
def _fused_unet_kernel(p1_ref, w1t_ref, b1_ref, temb_ref, mask_ref,
                       w2t_ref, b2_ref, out_ref, p2_ref, *,
                       hidden, L, OFF, Wp):
    # ---- conv1: single im2col matmul, channel-major output (hidden, LE) ----
    h = jnp.dot(w1t_ref[...], p1_ref[0], preferred_element_type=jnp.float32)
    h = h + b1_ref[...] + temb_ref[0]          # conv bias + per-sample FiLM bias
    h = h * jax.nn.sigmoid(h)                  # SiLU
    h = h * mask_ref[...]                      # zero padding ring + extension

    # ---- conv2: build the im2col slab from 9 static lane-shifted views of h.
    # h lives in the padded-flat layout (row stride Wp = W+2), so a spatial tap
    # (dy, dx) is a single flat shift s and the zeroed ring supplies the conv
    # padding automatically (no wrap-around, no gather).
    for tap in range(9):
        dy, dx = tap // 3, tap % 3
        s = (dy - 1) * Wp + (dx - 1)
        p2_ref[pl.ds(tap * hidden, hidden), :] = h[:, OFF + s:OFF + s + L]

    # ---- conv2: single K = 9*hidden matmul, lane-dense (cout, L) output ----
    out = jnp.dot(w2t_ref[...], p2_ref[...], preferred_element_type=jnp.float32)
    out_ref[0] = (out + b2_ref[...]).astype(out_ref.dtype)


def fused_unet(p1, w1t, b1c, temb_col, mask, w2t, b2c, *, H, W, cin, hidden):
    B = p1.shape[0]
    Hp, Wp = H + 2, W + 2
    L = Hp * Wp
    LE = p1.shape[-1]
    OFF = (LE - L) // 2

    kernel = functools.partial(_fused_unet_kernel,
                               hidden=hidden, L=L, OFF=OFF, Wp=Wp)
    return pl.pallas_call(
        kernel,
        out_shape=jax.ShapeDtypeStruct((B, cin, L), jnp.float32),
        grid=(B,),
        in_specs=[
            pl.BlockSpec((1, 9 * cin, LE), lambda b: (b, 0, 0)),   # im2col of x
            pl.BlockSpec(w1t.shape, lambda b: (0, 0)),             # (hidden, 9*cin)
            pl.BlockSpec(b1c.shape, lambda b: (0, 0)),             # (hidden, 1)
            pl.BlockSpec((1, hidden, 1), lambda b: (b, 0, 0)),     # per-sample FiLM
            pl.BlockSpec(mask.shape, lambda b: (0, 0)),            # (1, LE)
            pl.BlockSpec(w2t.shape, lambda b: (0, 0)),             # (cout, 9*hidden)
            pl.BlockSpec(b2c.shape, lambda b: (0, 0)),             # (cout, 1)
        ],
        out_specs=pl.BlockSpec((1, cin, L), lambda b: (b, 0, 0)),
        scratch_shapes=[pltpu.VMEM((9 * hidden, L), jnp.float32)],  # conv2 im2col
        compiler_params=pltpu.CompilerParams(
            dimension_semantics=("parallel",)),                    # feeds both v7x TCs
    )(p1, w1t, b1c, temb_col, mask, w2t, b2c)


# ---------------------------------------------------------------------------
# Glue: embeddings, parameters, forward pass
# ---------------------------------------------------------------------------
def sinusoidal_embedding(t_int, dim=EMB_DIM):
    half = dim // 2
    freqs = jnp.exp(-math.log(10000.0)
                    * jnp.arange(half, dtype=jnp.float32) / half)
    args = t_int.astype(jnp.float32)[:, None] * freqs[None, :]
    return jnp.concatenate([jnp.cos(args), jnp.sin(args)], axis=-1)


def init_unet_params(key, cin=4, hidden=HIDDEN, emb_dim=EMB_DIM):
    ks = jax.random.split(key, 4)

    def w(k, shape, fan_in):
        return jax.random.normal(k, shape, jnp.float32) / jnp.sqrt(
            jnp.float32(fan_in))

    return {
        "mlp_w1": w(ks[0], (emb_dim, hidden), emb_dim),
        "mlp_b1": jnp.zeros((1, hidden), jnp.float32),
        "mlp_w2": w(ks[1], (hidden, hidden), hidden),
        "mlp_b2": jnp.zeros((1, hidden), jnp.float32),
        "conv1_w": w(ks[2], (3, 3, cin, hidden), 9 * cin),
        "conv1_b": jnp.zeros((hidden,), jnp.float32),
        "conv2_w": w(ks[3], (3, 3, hidden, cin), 9 * hidden),
        "conv2_b": jnp.zeros((cin,), jnp.float32),
    }


def epsilon_net_ddrm_forward(params, x_nchw, t):
    """Mirrors EpsilonNetDDRM.forward: t = t.to(int); return unet(x, t)."""
    # TODO(synk): the real `unet` is an externally injected module; this is a
    # deterministic synthetic surrogate with the same (x, t) -> eps signature.
    t_int = t.astype(jnp.int32)                       # t.to(int)
    B, C, H, W = x_nchw.shape
    Hp, Wp = H + 2, W + 2
    L = Hp * Wp                                       # padded-flat spatial length
    OFF = Wp + 2                                      # >= max flat tap shift (Wp+1)
    LE = L + 2 * OFF                                  # extended width for shifts

    # --- time-embedding MLP (tiny -> plain XLA, no kernel launch) ---
    emb = sinusoidal_embedding(t_int)                                 # (B, EMB)
    h1 = emb @ params["mlp_w1"] + params["mlp_b1"]
    h1 = h1 * jax.nn.sigmoid(h1)
    temb = h1 @ params["mlp_w2"] + params["mlp_b2"]                   # (B, hidden)
    temb_col = temb[:, :, None].astype(jnp.float32)                   # (B, hidden, 1)

    # --- conv1 im2col, channel-major, placed in the padded-flat layout ---
    xf = x_nchw.astype(jnp.float32)
    xp = jnp.pad(xf, ((0, 0), (0, 0), (1, 1), (1, 1)))                # NCHW, pad=1
    taps = [xp[:, :, dy:dy + H, dx:dx + W]
            for dy in range(3) for dx in range(3)]                    # 9 x (B,C,H,W)
    pat = jnp.stack(taps, axis=1).reshape(B, 9 * C, H, W)             # rows tap*C+ci
    p1 = jnp.zeros((B, 9 * C, Hp, Wp), jnp.float32)
    p1 = p1.at[:, :, 1:1 + H, 1:1 + W].set(pat).reshape(B, 9 * C, L)
    p1 = jnp.pad(p1, ((0, 0), (0, 0), (OFF, OFF)))                    # (B, 9C, LE)

    mask = jnp.zeros((Hp, Wp), jnp.float32)
    mask = mask.at[1:1 + H, 1:1 + W].set(1.0).reshape(1, L)
    mask = jnp.pad(mask, ((0, 0), (OFF, OFF)))                        # (1, LE)

    # --- weights in transposed / flattened layouts for the fused kernel ---
    w1t = params["conv1_w"].reshape(9 * C, HIDDEN).T                  # (hidden, 9C)
    b1c = params["conv1_b"].reshape(HIDDEN, 1)
    w2t = params["conv2_w"].reshape(9 * HIDDEN, C).T                  # (C, 9*hidden)
    b2c = params["conv2_b"].reshape(C, 1)

    out_pad = fused_unet(p1, w1t, b1c, temb_col, mask, w2t, b2c,
                         H=H, W=W, cin=C, hidden=HIDDEN)              # (B, C, L)

    # Already channel-major (NCHW); just drop the padding ring.
    eps = out_pad.reshape(B, C, Hp, Wp)[:, :, 1:1 + H, 1:1 + W]
    return eps.astype(x_nchw.dtype)


if __name__ == "__main__":
    key = jax.random.PRNGKey(0)
    kx, kt, kp = jax.random.split(key, 3)

    x = jax.random.normal(kx, (2, 4, 16, 16), dtype=jnp.float32)   # NCHW
    t = jax.random.uniform(kt, (2,), minval=0.0, maxval=999.0)     # float -> int inside
    params = init_unet_params(kp)

    fwd = jax.jit(functools.partial(epsilon_net_ddrm_forward, params))
    out = fwd(x, t)
    jax.block_until_ready(out)

    assert out.shape == x.shape, (out.shape, x.shape)
    assert out.dtype == x.dtype
    assert bool(jnp.all(jnp.isfinite(out)))
    print("KERNEL_OK")
</pallas_src>

<mosaic_0001>
module attributes {stable_mosaic.version = 11 : i64} {
  func.func @_fused_unet_kernel(%arg0: i32, %arg1: memref<1x36x364xf32, #tpu.memory_space<vmem>>, %arg2: memref<32x36xf32, #tpu.memory_space<vmem>>, %arg3: memref<32x1xf32, #tpu.memory_space<vmem>>, %arg4: memref<1x32x1xf32, #tpu.memory_space<vmem>>, %arg5: memref<1x364xf32, #tpu.memory_space<vmem>>, %arg6: memref<4x288xf32, #tpu.memory_space<vmem>>, %arg7: memref<4x1xf32, #tpu.memory_space<vmem>>, %arg8: memref<1x4x324xf32, #tpu.memory_space<vmem>>, %arg9: memref<288x324xf32, #tpu.memory_space<vmem>>) attributes {dimension_semantics = [#tpu.dimension_semantics<parallel>], iteration_bounds = array<i64: 2>, scalar_prefetch = 0 : i64, scratch_operands = 1 : i64, tpu.core_type = #tpu.core_type<tc>, window_params = [{transform_indices = @transform_0, window_bounds = array<i64: 1, 36, 364>}, {pipeline_mode = #tpu.pipeline_mode<synchronous>, transform_indices = @transform_1, window_bounds = array<i64: 32, 36>}, {pipeline_mode = #tpu.pipeline_mode<synchronous>, transform_indices = @transform_2, window_bounds = array<i64: 32, 1>}, {transform_indices = @transform_3, window_bounds = array<i64: 1, 32, 1>}, {pipeline_mode = #tpu.pipeline_mode<synchronous>, transform_indices = @transform_4, window_bounds = array<i64: 1, 364>}, {pipeline_mode = #tpu.pipeline_mode<synchronous>, transform_indices = @transform_5, window_bounds = array<i64: 4, 288>}, {pipeline_mode = #tpu.pipeline_mode<synchronous>, transform_indices = @transform_6, window_bounds = array<i64: 4, 1>}, {transform_indices = @transform_7, window_bounds = array<i64: 1, 4, 324>}]} {
    %c0 = arith.constant 0 : index
    %c0_0 = arith.constant 0 : index
    %0 = vector.load %arg2[%c0, %c0_0] : memref<32x36xf32, #tpu.memory_space<vmem>>, vector<32x36xf32>
    %c0_1 = arith.constant 0 : index
    %c0_2 = arith.constant 0 : index
    %c0_3 = arith.constant 0 : index
    %1 = vector.load %arg1[%c0_1, %c0_2, %c0_3] : memref<1x36x364xf32, #tpu.memory_space<vmem>>, vector<1x36x364xf32>
    %2 = vector.shape_cast %1 : vector<1x36x364xf32> to vector<36x364xf32>
    %cst = arith.constant dense<0.000000e+00> : vector<32x364xf32>
    %3 = tpu.matmul %0, %2, %cst {dimension_numbers = #tpu.dot_dimension_numbers<[1], [0], [0], [1], [0, 0, 1, 1], [], []>} : vector<32x36xf32>, vector<36x364xf32>, vector<32x364xf32> -> vector<32x364xf32>
    %c0_4 = arith.constant 0 : index
    %c0_5 = arith.constant 0 : index
    %4 = vector.load %arg3[%c0_4, %c0_5] : memref<32x1xf32, #tpu.memory_space<vmem>>, vector<32x1xf32>
    %5 = vector.broadcast %4 : vector<32x1xf32> to vector<32x364xf32>
    %6 = arith.addf %3, %5 : vector<32x364xf32>
    %c0_6 = arith.constant 0 : index
    %c0_7 = arith.constant 0 : index
    %c0_8 = arith.constant 0 : index
    %7 = vector.load %arg4[%c0_6, %c0_7, %c0_8] : memref<1x32x1xf32, #tpu.memory_space<vmem>>, vector<1x32x1xf32>
    %8 = vector.shape_cast %7 : vector<1x32x1xf32> to vector<32x1xf32>
    %9 = vector.broadcast %8 : vector<32x1xf32> to vector<32x364xf32>
    %10 = arith.addf %6, %9 : vector<32x364xf32>
    %11 = arith.negf %10 : vector<32x364xf32>
    %12 = math.exp %11 : vector<32x364xf32>
    %cst_9 = arith.constant 1.000000e+00 : f32
    %13 = vector.broadcast %cst_9 : f32 to vector<32x364xf32>
    %14 = arith.addf %13, %12 : vector<32x364xf32>
    %15 = arith.divf %13, %14 : vector<32x364xf32>
    %16 = arith.mulf %10, %15 : vector<32x364xf32>
    %c0_10 = arith.constant 0 : index
    %c0_11 = arith.constant 0 : index
    %17 = vector.load %arg5[%c0_10, %c0_11] : memref<1x364xf32, #tpu.memory_space<vmem>>, vector<1x364xf32>
    %18 = vector.broadcast %17 : vector<1x364xf32> to vector<32x364xf32>
    %19 = arith.mulf %16, %18 : vector<32x364xf32>
    %20 = vector.extract_strided_slice %19 {offsets = [0, 1], sizes = [32, 324], strides = [1, 1]} : vector<32x364xf32> to vector<32x324xf32>
    %c0_12 = arith.constant 0 : index
    %c0_13 = arith.constant 0 : index
    %21 = vector.load %arg9[%c0_12, %c0_13] : memref<288x324xf32, #tpu.memory_space<vmem>>, vector<32x324xf32>
    tpu.vector_store %arg9[%c0_12, %c0_13], %20 {strides = array<i32>} : memref<288x324xf32, #tpu.memory_space<vmem>>, vector<32x324xf32>,
    %22 = vector.extract_strided_slice %19 {offsets = [0, 2], sizes = [32, 324], strides = [1, 1]} : vector<32x364xf32> to vector<32x324xf32>
    %c32 = arith.constant 32 : index
    %c0_14 = arith.constant 0 : index
    %23 = vector.load %arg9[%c32, %c0_14] : memref<288x324xf32, #tpu.memory_space<vmem>>, vector<32x324xf32>
    tpu.vector_store %arg9[%c32, %c0_14], %22 {strides = array<i32>} : memref<288x324xf32, #tpu.memory_space<vmem>>, vector<32x324xf32>,
    %24 = vector.extract_strided_slice %19 {offsets = [0, 3], sizes = [32, 324], strides = [1, 1]} : vector<32x364xf32> to vector<32x324xf32>
    %c64 = arith.constant 64 : index
    %c0_15 = arith.constant 0 : index
    %25 = vector.load %arg9[%c64, %c0_15] : memref<288x324xf32, #tpu.memory_space<vmem>>, vector<32x324xf32>
    tpu.vector_store %arg9[%c64, %c0_15], %24 {strides = array<i32>} : memref<288x324xf32, #tpu.memory_space<vmem>>, vector<32x324xf32>,
    %26 = vector.extract_strided_slice %19 {offsets = [0, 19], sizes = [32, 324], strides = [1, 1]} : vector<32x364xf32> to vector<32x324xf32>
    %c96 = arith.constant 96 : index
    %c0_16 = arith.constant 0 : index
    %27 = vector.load %arg9[%c96, %c0_16] : memref<288x324xf32, #tpu.memory_space<vmem>>, vector<32x324xf32>
    tpu.vector_store %arg9[%c96, %c0_16], %26 {strides = array<i32>} : memref<288x324xf32, #tpu.memory_space<vmem>>, vector<32x324xf32>,
    %28 = vector.extract_strided_slice %19 {offsets = [0, 20], sizes = [32, 324], strides = [1, 1]} : vector<32x364xf32> to vector<32x324xf32>
    %c128 = arith.constant 128 : index
    %c0_17 = arith.constant 0 : index
    %29 = vector.load %arg9[%c128, %c0_17] : memref<288x324xf32, #tpu.memory_space<vmem>>, vector<32x324xf32>
    tpu.vector_store %arg9[%c128, %c0_17], %28 {strides = array<i32>} : memref<288x324xf32, #tpu.memory_space<vmem>>, vector<32x324xf32>,
    %30 = vector.extract_strided_slice %19 {offsets = [0, 21], sizes = [32, 324], strides = [1, 1]} : vector<32x364xf32> to vector<32x324xf32>
    %c160 = arith.constant 160 : index
    %c0_18 = arith.constant 0 : index
    %31 = vector.load %arg9[%c160, %c0_18] : memref<288x324xf32, #tpu.memory_space<vmem>>, vector<32x324xf32>
    tpu.vector_store %arg9[%c160, %c0_18], %30 {strides = array<i32>} : memref<288x324xf32, #tpu.memory_space<vmem>>, vector<32x324xf32>,
    %32 = vector.extract_strided_slice %19 {offsets = [0, 37], sizes = [32, 324], strides = [1, 1]} : vector<32x364xf32> to vector<32x324xf32>
    %c192 = arith.constant 192 : index
    %c0_19 = arith.constant 0 : index
    %33 = vector.load %arg9[%c192, %c0_19] : memref<288x324xf32, #tpu.memory_space<vmem>>, vector<32x324xf32>
    tpu.vector_store %arg9[%c192, %c0_19], %32 {strides = array<i32>} : memref<288x324xf32, #tpu.memory_space<vmem>>, vector<32x324xf32>,
    %34 = vector.extract_strided_slice %19 {offsets = [0, 38], sizes = [32, 324], strides = [1, 1]} : vector<32x364xf32> to vector<32x324xf32>
    %c224 = arith.constant 224 : index
    %c0_20 = arith.constant 0 : index
    %35 = vector.load %arg9[%c224, %c0_20] : memref<288x324xf32, #tpu.memory_space<vmem>>, vector<32x324xf32>
    tpu.vector_store %arg9[%c224, %c0_20], %34 {strides = array<i32>} : memref<288x324xf32, #tpu.memory_space<vmem>>, vector<32x324xf32>,
    %36 = vector.extract_strided_slice %19 {offsets = [0, 39], sizes = [32, 324], strides = [1, 1]} : vector<32x364xf32> to vector<32x324xf32>
    %c256 = arith.constant 256 : index
    %c0_21 = arith.constant 0 : index
    %37 = vector.load %arg9[%c256, %c0_21] : memref<288x324xf32, #tpu.memory_space<vmem>>, vector<32x324xf32>
    tpu.vector_store %arg9[%c256, %c0_21], %36 {strides = array<i32>} : memref<288x324xf32, #tpu.memory_space<vmem>>, vector<32x324xf32>,
    %c0_22 = arith.constant 0 : index
    %c0_23 = arith.constant 0 : index
    %38 = vector.load %arg6[%c0_22, %c0_23] : memref<4x288xf32, #tpu.memory_space<vmem>>, vector<4x288xf32>
    %c0_24 = arith.constant 0 : index
    %c0_25 = arith.constant 0 : index
    %39 = vector.load %arg9[%c0_24, %c0_25] : memref<288x324xf32, #tpu.memory_space<vmem>>, vector<288x324xf32>
    %cst_26 = arith.constant dense<0.000000e+00> : vector<4x324xf32>
    %40 = tpu.matmul %38, %39, %cst_26 {dimension_numbers = #tpu.dot_dimension_numbers<[1], [0], [0], [1], [0, 0, 1, 1], [], []>} : vector<4x288xf32>, vector<288x324xf32>, vector<4x324xf32> -> vector<4x324xf32>
    %c0_27 = arith.constant 0 : index
    %c0_28 = arith.constant 0 : index
    %41 = vector.load %arg7[%c0_27, %c0_28] : memref<4x1xf32, #tpu.memory_space<vmem>>, vector<4x1xf32>
    %42 = vector.broadcast %41 : vector<4x1xf32> to vector<4x324xf32>
    %43 = arith.addf %40, %42 : vector<4x324xf32>
    %c0_29 = arith.constant 0 : index
    %c0_30 = arith.constant 0 : index
    %c0_31 = arith.constant 0 : index
    %44 = vector.load %arg8[%c0_29, %c0_30, %c0_31] : memref<1x4x324xf32, #tpu.memory_space<vmem>>, vector<1x4x324xf32>
    %45 = vector.shape_cast %44 : vector<1x4x324xf32> to vector<4x324xf32>
    %46 = vector.shape_cast %43 : vector<4x324xf32> to vector<1x4x324xf32>
    tpu.vector_store %arg8[%c0_29, %c0_30, %c0_31], %46 {strides = array<i32>} : memref<1x4x324xf32, #tpu.memory_space<vmem>>, vector<1x4x324xf32>,
    return
  }
  func.func @transform_0(%arg0: i32) -> (i32, i32, i32) {
    %c0_i32 = arith.constant 0 : i32
    %c0_i32_0 = arith.constant 0 : i32
    %c0_i32_1 = arith.constant 0 : i32
    return %arg0, %c0_i32, %c0_i32_0 : i32, i32, i32
  }
  func.func @transform_1(%arg0: i32) -> (i32, i32) {
    %c0_i32 = arith.constant 0 : i32
    %c0_i32_0 = arith.constant 0 : i32
    %c0_i32_1 = arith.constant 0 : i32
    return %c0_i32, %c0_i32_0 : i32, i32
  }
  func.func @transform_2(%arg0: i32) -> (i32, i32) {
    %c0_i32 = arith.constant 0 : i32
    %c0_i32_0 = arith.constant 0 : i32
    %c0_i32_1 = arith.constant 0 : i32
    return %c0_i32, %c0_i32_0 : i32, i32
  }
  func.func @transform_3(%arg0: i32) -> (i32, i32, i32) {
    %c0_i32 = arith.constant 0 : i32
    %c0_i32_0 = arith.constant 0 : i32
    %c0_i32_1 = arith.constant 0 : i32
    return %arg0, %c0_i32, %c0_i32_0 : i32, i32, i32
  }
  func.func @transform_4(%arg0: i32) -> (i32, i32) {
    %c0_i32 = arith.constant 0 : i32
    %c0_i32_0 = arith.constant 0 : i32
    %c0_i32_1 = arith.constant 0 : i32
    return %c0_i32, %c0_i32_0 : i32, i32
  }
  func.func @transform_5(%arg0: i32) -> (i32, i32) {
    %c0_i32 = arith.constant 0 : i32
    %c0_i32_0 = arith.constant 0 : i32
    %c0_i32_1 = arith.constant 0 : i32
    return %c0_i32, %c0_i32_0 : i32, i32
  }
  func.func @transform_6(%arg0: i32) -> (i32, i32) {
    %c0_i32 = arith.constant 0 : i32
    %c0_i32_0 = arith.constant 0 : i32
    %c0_i32_1 = arith.constant 0 : i32
    return %c0_i32, %c0_i32_0 : i32, i32
  }
  func.func @transform_7(%arg0: i32) -> (i32, i32, i32) {
    %c0_i32 = arith.constant 0 : i32
    %c0_i32_0 = arith.constant 0 : i32
    %c0_i32_1 = arith.constant 0 : i32
    return %arg0, %c0_i32, %c0_i32_0 : i32, i32, i32
  }
}

</mosaic_0001>

<bundles_post_ra>
// kernel: epsilon_net_ddrm_forward.1
= control target key start
LH: loop header
LB: loop body
LE: loop exit
PB: predicated region body
PF: predicated region fallthrough
CT: control target
= control target key end

     0   :  { %s1939_s24 = smov 0   ;;  %s2693_s0 = inlined_call_operand.vmem [shape: f32[2,36,364], index: 0, kind: input, shape index: {}]   ;;  %s2694_s1 = inlined_call_operand.vmem [shape: f32[32,36], index: 1, kind: input, shape index: {}]   ;;  %s2695_s2 = inlined_call_operand.vmem [shape: f32[32,1], index: 2, kind: input, shape index: {}]   ;;  %s2696_s3 = inlined_call_operand.vmem [shape: f32[2,32,1], index: 3, kind: input, shape index: {}]   ;;  %s2697_s4 = inlined_call_operand.vmem [shape: f32[1,364], index: 4, kind: input, shape index: {}]   ;;  %s2698_s5 = inlined_call_operand.vmem [shape: f32[4,288], index: 5, kind: input, shape index: {}]   ;;  %s2699_s6 = inlined_call_operand.vmem [shape: f32[4,1], index: 6, kind: input, shape index: {}]   ;;  %s2700_s7 = inlined_call_operand.vmem [shape: f32[2,4,324], index: 7, kind: output, shape index: {}]  }
   0x1 LB: > { %s1693_s25 = sadd.s32 4294967295, %s1885_s24   ;;  %p1697_p0 = scmp.ge.s32.totalorder %s1885_s24, 1  ;;  %s1885_s24 = sphi %s1939_s24, %s17_s24  }
   0x2   : > { %p247_p1 = scmp.lt.s32.totalorder %s1885_s24, 3 }
   0x4   : > { %p248_p2 = pnand %p1697_p0, %p247_p1 }
   0x5   : > { %p284_p3 = scmp.lt.s32.totalorder (!%p248_p2), %s1693_s25, 1  ;;  %s1889_s8 = smov (!%p248_p2), 89  }
   0x6   : > { %251 = sbr.rel (%p248_p2) target bundleno = 798 (0x31e), region = 48  ;;  %s1891_s10 = smov (!%p248_p2), 127  }
   0x7   : > { %s1892_s11 = smov (!%p248_p2), 125   ;;  %s1894_s13 = smov (!%p248_p2), 126  }
   0x8   : > { %s1895_s14 = smov (!%p248_p2), 91   ;;  %s1897_s16 = smov (!%p248_p2), 108  }
   0xb   : > { %v299_v0 = vld [vmem:[%s2694_s1] sm:$0xff]  ;;  %vm342_vm0 = vcmask 293888   ;;  %v2701_v1 = vmov 0.0   ;;  %v321_v2 = vld [vmem:[%s2695_s2 + $0x18] sm:$0xff]  ;;  %s2705_s25 = smov (!%p284_p3, %s1693_s25), 1  ;;  %v1888_v3 = vmov 0   ;;  %v661_v55 = vlaneseq }
   0xc   : > { %429 = vmatprep.mubr.f32.mxu0 %v2701_v1  ;;  %1789 = vmatprep.mubr.msk.f32.mxu1 %vm342_vm0, %v299_v0  ;;  %v319_v4 = vld [vmem:[%s2695_s2 + $0x8] sm:$0xff]  ;;  %s1806_s9 = smul.u32 120, %s2705_s25  ;;  %v320_v5 = vld [vmem:[%s2695_s2 + $0x10] sm:$0xff]  ;;  %s1729_s12 = sshll.u32 %s2705_s25, 5  ;;  %vm355_vm1 = vcmask 1043456   ;;  %v318_v25 = vld [vmem:[%s2695_s2] sm:$0xff] }
   0xd   : > { %1828 = vset.pattern.permute.xlu0 %v1888_v3  ;;  %1829 = vset.pattern.permute.xlu1 %v1888_v3  ;;  %s1968_s15 = scalar_lea.vmem %s2696_s3, %s1729_s12  ;;  %v300_v22 = vld [vmem:[%s2694_s1 + $0x8] sm:$0xff]  ;;  %v301_v23 = vld [vmem:[%s2694_s1 + $0x10] sm:$0xff]  ;;  %v302_v26 = vld [vmem:[%s2694_s1 + $0x18] sm:$0xff]  ;;  %v2033_v57 = vshrl.u32 %v661_v55, 7  ;;  %s1893_s12 = smov 90   ;;  %vm747_vm2 = vcmask 556032  }
   0xe   : > { %339 = vperm.xlu0 %1828, %v321_v2   ;;  %329 = vperm.xlu1 %1829, %v319_v4   ;;  %s1973_s18 = scalar_lea.vmem %s2693_s0, %s1806_s9  ;;  %v542_v6 = vld [vmem:[%s1968_s15 + $0x18] sm:$0xff]  ;;  %v541_v24 = vld [vmem:[%s1968_s15 + $0x10] sm:$0xff]  ;;  %v540_v27 = vld [vmem:[%s1968_s15 + $0x8] sm:$0xff]  ;;  %s1890_s9 = smov 109   ;;  %vm896_vm3 = vcmask 891904   ;;  %vm1124_vm4 = vcmask 736256  }
   0xf   : > { %v316_v7 = vld [vmem:[%s1973_s18 + $0x68] sm:$0xf]  ;;  %v317_v8 = vld [vmem:[%s1973_s18 + $0x70] sm:$0xf]  ;;  %v315_v9 = vld [vmem:[%s1973_s18 + $0x60] sm:$0xf] }
  0x10   : > { %1702 = vmatprep.subr.msk.mxu0 %vm355_vm1, %v316_v7  ;;  %1779 = vmatprep.subr.msk.mxu1 %vm355_vm1, %v317_v8  ;;  %v313_v10 = vld [vmem:[%s1973_s18 + $0x50] sm:$0xff]  ;;  %v314_v11 = vld [vmem:[%s1973_s18 + $0x58] sm:$0xff]  ;;  %v312_v12 = vld [vmem:[%s1973_s18 + $0x48] sm:$0xff]  ;;  %v671_v61 = vsub.s32 2, %v2033_v57  ;;  %v663_v3 = vsub.s32 0, %v2033_v57  ;;  %vm839_vm5 = vcmask 1022976  }
  0x11   : > { %1703 = vmatpush1.msk.msra.mxu0 %vm355_vm1, %v315_v9  ;;  %1780 = vmatpush3.msk.msra.mxu1 %vm355_vm1, %v317_v8  ;;  %v310_v13 = vld [vmem:[%s1973_s18 + $0x38] sm:$0xff]  ;;  %v311_v14 = vld [vmem:[%s1973_s18 + $0x40] sm:$0xff]  ;;  %v309_v15 = vld [vmem:[%s1973_s18 + $0x30] sm:$0xff]  ;;  %vm782_vm6 = vcmask 1031168   ;;  %vm1181_vm7 = vcmask 728064   ;;  %vm724_vm8 = vcmask 1039360  }
  0x12   : > { %334 = vperm.xlu0 %1828, %v320_v5   ;;  %560 = vperm.xlu1 %1829, %v542_v6   ;;  %v307_v16 = vld [vmem:[%s1973_s18 + $0x20] sm:$0xff]  ;;  %v308_v17 = vld [vmem:[%s1973_s18 + $0x28] sm:$0xff]  ;;  %v306_v18 = vld [vmem:[%s1973_s18 + $0x18] sm:$0xff]  ;;  %vm1067_vm9 = vcmask 744448   ;;  %vm1010_vm10 = vcmask 875520   ;;  %vm1334_vm11 = vcmask 261120  }
  0x13   : > { %389 = vmatprep.subr.mxu0 %v313_v10  ;;  %1781 = vmatprep.subr.mxu1 %v314_v11  ;;  %v304_v19 = vld [vmem:[%s1973_s18 + $0x8] sm:$0xff]  ;;  %v305_v20 = vld [vmem:[%s1973_s18 + $0x10] sm:$0xff]  ;;  %v303_v21 = vld [vmem:[%s1973_s18] sm:$0xff]  ;;  %vm953_vm12 = vcmask 883712   ;;  %vm1898_vm13 = vmmov 0   ;;  %s1807_s23 = smul.u32 12, %s2705_s25 }
  0x14   : > { %390 = vmatpush1.msra.mxu0 %v312_v12  ;;  %1782 = vmatpush3.msra.mxu1 %v314_v11  ;;  %v539_v28 = vld [vmem:[%s1968_s15] sm:$0xff]  ;;  %s1896_s15 = smov 107   ;;  %vm1624_vm14 = vcmask 551936  }
  0x15   : > { %391 = vmatprep.subr.mxu0 %v310_v13  ;;  %1783 = vmatprep.subr.mxu1 %v311_v14  ;;  %s298_s28 = scalar_lea.vmem %s2700_s7, %s1807_s23 }
  0x16   : > { %392 = vmatpush1.msra.mxu0 %v309_v15  ;;  %1784 = vmatpush3.msra.mxu1 %v311_v14 }
  0x17   : > { %393 = vmatprep.subr.mxu0 %v307_v16  ;;  %1785 = vmatprep.subr.mxu1 %v308_v17 }
  0x18   : > { %394 = vmatpush1.msra.mxu0 %v306_v18  ;;  %1786 = vmatpush3.msra.mxu1 %v308_v17 }
  0x19   : > { %395 = vmatprep.subr.mxu0 %v304_v19  ;;  %1787 = vmatprep.subr.mxu1 %v305_v20 }
  0x1a   : > { %396 = vmatpush1.msra.mxu0 %v303_v21  ;;  %1788 = vmatpush3.msra.mxu1 %v305_v20 }
  0x1b   : > { %1704 = vmatmul.mubr.msk.f32.vlgmr.msra.gmra.mxu0 %vm342_vm0, %v299_v0  ;;  %1790 = vmatmul.mubr.msk.f32.vlgmr.msra.gmra.mxu1 %vm342_vm0, %v300_v22  ;;  %v2041_v0 = vld [vmem:[%s2697_s4] sm:$0x7] }
  0x1c   : > { %435 = vmatprep.mubr.f32.mxu0 %v2701_v1  ;;  %1792 = vmatprep.mubr.msk.f32.mxu1 %vm342_vm0, %v301_v23  ;;  %v2045_v4 = vrot.slane %v2041_v0, %v671_v61  ;;  %v2051_v9 = vrot.slane %v2041_v0, %v663_v3 }
  0x1d   : > { %555 = vperm.xlu0 %1828, %v541_v24   ;;  %324 = vperm.xlu1 %1829, %v318_v25  }
  0x1f   : > { %1705 = vmatmul.mubr.msk.f32.gmra.mxu0 %vm342_vm0, %v300_v22  ;;  %1793 = vmatmul.mubr.msk.f32.gmra.mxu1 %vm342_vm0, %v302_v26 }
  0x20   : > { %441 = vmatprep.mubr.f32.mxu0 %v2701_v1  ;;  %1472 = vmatprep.mubr.f32.mxu1 %v2701_v1 }
  0x21   : > { %550 = vperm.xlu0 %1828, %v540_v27   ;;  %545 = vperm.xlu1 %1829, %v539_v28  }
  0x23   : > { %1706 = vmatmul.mubr.msk.f32.gmra.mxu0 %vm342_vm0, %v301_v23 }
  0x24   : > { %447 = vmatprep.mubr.f32.mxu0 %v2701_v1 }
  0x27   : > { %1707 = vmatmul.mubr.msk.f32.gmra.mxu0 %vm342_vm0, %v302_v26 }
  0x89   : > { %v2017_v29 = vpop.permute.xlu0 %339  ;;  %v2019_v30 = vpop.permute.xlu1 %329 }
  0x8d   : > { %v2021_v31 = vpop.permute.xlu0 %334  ;;  %v2023_v32 = vpop.permute.xlu1 %560 }
  0x98   : > { %v2025_v33 = vpop.permute.xlu0 %555  ;;  %v325_v34 = vpop.permute.xlu1 %324 }
  0x9c   : > { %v2027_v37 = vpop.permute.xlu0 %550  ;;  %v546_v40 = vpop.permute.xlu1 %545 }
  0xdb   : > { %v431_v35 = vpop.f32.mrf.mxu0  ;;  %v1791_v36 = vpop.f32.mrf.mxu1 }
  0xdc   : > { %v432_v38 = vadd.f32 %v431_v35, %v325_v34  ;;  %v526_v39 = vadd.f32 %v1791_v36, %v2019_v30  ;;  %v667_v36 = vsub.s32 1, %v2033_v57 }
  0xdd   : > { %v520_v41 = vpop.f32.mrf.mxu1  ;;  %v433_v50 = vpop.f32.mrf.mxu0 }
  0xde   : > { %v563_v42 = vadd.f32 %v546_v40, %v432_v38  ;;  %v568_v43 = vadd.f32 %v2027_v37, %v526_v39  ;;  %v521_v44 = vadd.f32 %v520_v41, %v325_v34  ;;  %v434_v54 = vadd.f32 %v433_v50, %v325_v34 }
  0xdf   : > { %v437_v59 = vpop.f32.mrf.mxu0  ;;  %v1794_v12 = vpop.f32.mrf.mxu1  ;;  %v2107_v41 = vrot.slane %v2041_v0, %v667_v36 }
  0xe0   : > { %v1713_v45 = vmul.f32 -1.442695, %v563_v42  ;;  %v1718_v46 = vmul.f32 -1.442695, %v568_v43  ;;  %v565_v47 = vadd.f32 %v546_v40, %v521_v44  ;;  %v2031_v56 = vadd.f32 %v546_v40, %v434_v54 }
  0xe1   : > { %v438_v63 = vadd.f32 %v437_v59, %v2019_v30  ;;  %v536_v13 = vadd.f32 %v1794_v12, %v2017_v29  ;;  %v530_v23 = vpop.f32.mrf.mxu1  ;;  %v439_v25 = vpop.f32.mrf.mxu0 }
  0xe2   : > { %1831 = vpow2.f32 %v1713_v45  ;;  %v1715_v48 = vmul.f32 -1.442695, %v565_v47  ;;  %v1714_v60 = vmul.f32 -1.442695, %v2031_v56  ;;  %v531_v26 = vadd.f32 %v530_v23, %v2021_v31 }
  0xe3   : > { %1833 = vpow2.f32 %v1718_v46  ;;  %v2048_v5 = vadd.f32 %v2027_v37, %v438_v63  ;;  %v2070_v15 = vadd.f32 %v2023_v32, %v536_v13  ;;  %v440_v27 = vadd.f32 %v439_v25, %v2019_v30  ;;  %v443_v45 = vpop.f32.mrf.mxu0 }
  0xe4   : > { %1835 = vpow2.f32 %v1715_v48  ;;  %v571_v28 = vadd.f32 %v2025_v33, %v531_v26  ;;  %v444_v46 = vadd.f32 %v443_v45, %v2021_v31 }
  0xe5   : > { %v1716_v11 = vmul.f32 -1.442695, %v2048_v5  ;;  %v1724_v18 = vmul.f32 -1.442695, %v2070_v15  ;;  %v567_v34 = vadd.f32 %v2027_v37, %v440_v27  ;;  %v445_v57 = vpop.f32.mrf.mxu0 }
  0xe6   : > { %v1721_v38 = vmul.f32 -1.442695, %v571_v28 }
  0xe7   : > { %v1717_v30 = vmul.f32 -1.442695, %v567_v34 }
  0xef   : > { %v1832_v49 = vpop.eup %1831 }
  0xf0   : > { %v1834_v51 = vpop.eup %1833  ;;  %v611_v52 = vadd.f32 1.0, %v1832_v49  ;;  %v569_v49 = vadd.f32 %v2025_v33, %v444_v46 }
  0xf1   : > { %v616_v53 = vadd.f32 1.0, %v1834_v51  ;;  %v1836_v58 = vpop.eup %1835 }
  0xf2   : > { %1837 = vrcp.f32 %v611_v52  ;;  %v613_v62 = vadd.f32 1.0, %v1836_v58  ;;  %v446_v58 = vadd.f32 %v445_v57, %v2021_v31 }
  0xf3   : > { %1839 = vrcp.f32 %v616_v53  ;;  %v1719_v53 = vmul.f32 -1.442695, %v569_v49 }
  0xf4   : > { %1841 = vpow2.f32 %v1714_v60  ;;  %v570_v59 = vadd.f32 %v2025_v33, %v446_v58 }
  0xf5   : > { %1843 = vrcp.f32 %v613_v62 }
  0xf6   : > { %1845 = vpow2.f32 %v1716_v11  ;;  %v1720_v63 = vmul.f32 -1.442695, %v570_v59 }
  0xf7   : > { %1847 = vpow2.f32 %v1724_v18 }
  0xff   : > { %v1838_v2 = vpop.eup %1837 }
 0x100   : > { %v1840_v6 = vpop.eup %1839  ;;  %v647_v8 = vmul.f32 %v1838_v2, %v563_v42 }
 0x101   : > { %v652_v7 = vmul.f32 %v1840_v6, %v568_v43  ;;  %v1842_v16 = vpop.eup %1841 }
 0x102   : > { %v2063_v14 = vmul.f32 %v2051_v9, %v647_v8  ;;  %v1844_v17 = vpop.eup %1843  ;;  %v612_v19 = vadd.f32 1.0, %v1842_v16 }
 0x103   : > { %v2054_v10 = vmul.f32 %v2045_v4, %v652_v7  ;;  %v649_v20 = vmul.f32 %v1844_v17, %v565_v47  ;;  %v1846_v22 = vpop.eup %1845 }
 0x104   : > { %1849 = vrcp.f32 %v612_v19  ;;  %v614_v24 = vadd.f32 1.0, %v1846_v22  ;;  %v1848_v35 = vpop.eup %1847 }
 0x105   : > { %1167 = vrot.lane.b32.xlu0 %v2054_v10, %s1889_s8  ;;  %882 = vrot.lane.b32.xlu1 %v2054_v10, %s1890_s9  ;;  %v2082_v21 = vmul.f32 %v2045_v4, %v649_v20  ;;  %v622_v42 = vadd.f32 1.0, %v1848_v35 }
 0x106   : > { %1851 = vrcp.f32 %v614_v24 }
 0x107   : > { %1853 = vpow2.f32 %v1721_v38 }
 0x108   : > { %1855 = vpow2.f32 %v1717_v30 }
 0x109   : > { %710 = vrot.lane.b32.xlu0 %v2054_v10, %s1891_s10  ;;  %872 = vrot.lane.b32.xlu1 %v2063_v14, %s1890_s9  ;;  %1857 = vrcp.f32 %v622_v42 }
 0x10d   : > { %1157 = vrot.lane.b32.xlu0 %v2063_v14, %s1889_s8  ;;  %825 = vrot.lane.b32.xlu1 %v2054_v10, %s1892_s11 }
 0x111   : > { %1100 = vrot.lane.b32.xlu0 %v2063_v14, %s1893_s12  ;;  %815 = vrot.lane.b32.xlu1 %v2063_v14, %s1892_s11  ;;  %v1850_v39 = vpop.eup %1849 }
 0x112   : > { %v648_v40 = vmul.f32 %v1850_v39, %v2031_v56 }
 0x113   : > { %v1852_v43 = vpop.eup %1851 }
 0x114   : > { %v2114_v37 = vmul.f32 %v2107_v41, %v648_v40  ;;  %v650_v44 = vmul.f32 %v1852_v43, %v2048_v5  ;;  %v1854_v48 = vpop.eup %1853  ;;  %v449_v5 = vpop.f32.mrf.mxu0 }
 0x115   : > { %876 = vrot.lane.b32.xlu0 %v2082_v21, %s1890_s9  ;;  %768 = vrot.lane.b32.xlu1 %v2054_v10, %s1894_s13  ;;  %v1856_v50 = vpop.eup %1855  ;;  %v619_v51 = vadd.f32 1.0, %v1854_v48 }
 0x116   : > { %v2127_v47 = vmul.f32 %v2051_v9, %v650_v44  ;;  %v1858_v52 = vpop.eup %1857  ;;  %v615_v55 = vadd.f32 1.0, %v1856_v50 }
 0x117   : > { %v658_v54 = vmul.f32 %v1858_v52, %v2070_v15  ;;  %1859 = vrcp.f32 %v619_v51  ;;  %v451_v15 = vpop.f32.mrf.mxu0 }
 0x118   : > { %1861 = vpow2.f32 %v1719_v53  ;;  %v452_v17 = vadd.f32 %v451_v15, %v2017_v29 }
 0x119   : > { %819 = vrot.lane.b32.xlu0 %v2082_v21, %s1892_s11  ;;  %758 = vrot.lane.b32.xlu1 %v2063_v14, %s1894_s13  ;;  %v2144_v56 = vmul.f32 %v2045_v4, %v658_v54  ;;  %1863 = vrcp.f32 %v615_v55 }
 0x11a   : > { %1865 = vpow2.f32 %v1720_v63  ;;  %v573_v18 = vadd.f32 %v2023_v32, %v452_v17 }
 0x11c   : > { %v1723_v20 = vmul.f32 -1.442695, %v573_v18 }
 0x11d   : > { %762 = vrot.lane.b32.xlu0 %v2082_v21, %s1894_s13  ;;  %700 = vrot.lane.b32.xlu1 %v2063_v14, %s1891_s10 }
 0x121   : > { %1161 = vrot.lane.b32.xlu0 %v2082_v21, %s1889_s8  ;;  %1110 = vrot.lane.b32.xlu1 %v2054_v10, %s1893_s12 }
 0x124   : > { %v1860_v60 = vpop.eup %1859 }
 0x125   : > { %704 = vrot.lane.b32.xlu0 %v2082_v21, %s1891_s10  ;;  %1053 = vrot.lane.b32.xlu1 %v2054_v10, %s1895_s14  ;;  %v1862_v61 = vpop.eup %1861  ;;  %v655_v62 = vmul.f32 %v1860_v60, %v571_v28 }
 0x126   : > { %v1864_v0 = vpop.eup %1863  ;;  %v617_v2 = vadd.f32 1.0, %v1862_v61 }
 0x127   : > { %v651_v31 = vmul.f32 %v1864_v0, %v567_v34  ;;  %v2165_v33 = vmul.f32 %v2045_v4, %v655_v62  ;;  %v450_v4 = vadd.f32 %v449_v5, %v2017_v29  ;;  %v1866_v7 = vpop.eup %1865 }
 0x128   : > { %1867 = vrcp.f32 %v617_v2  ;;  %v618_v11 = vadd.f32 1.0, %v1866_v7 }
 0x129   : > { %1104 = vrot.lane.b32.xlu0 %v2082_v21, %s1893_s12  ;;  %874 = vrot.lane.b32.xlu1 %v2114_v37, %s1890_s9  ;;  %v2172_v3 = vmul.f32 %v2107_v41, %v651_v31  ;;  %v572_v6 = vadd.f32 %v2023_v32, %v450_v4 }
 0x12b   : > { %v1722_v8 = vmul.f32 -1.442695, %v572_v6 }
 0x12d   : > { %1102 = vrot.lane.b32.xlu0 %v2114_v37, %s1893_s12  ;;  %817 = vrot.lane.b32.xlu1 %v2114_v37, %s1892_s11  ;;  %1869 = vpow2.f32 %v1722_v8 }
 0x12e   : > { %1871 = vrcp.f32 %v618_v11 }
 0x12f   : > { %1873 = vpow2.f32 %v1723_v20 }
 0x131   : > { %878 = vrot.lane.b32.xlu0 %v2127_v47, %s1890_s9  ;;  %760 = vrot.lane.b32.xlu1 %v2114_v37, %s1894_s13 }
 0x135   : > { %821 = vrot.lane.b32.xlu0 %v2127_v47, %s1892_s11  ;;  %1159 = vrot.lane.b32.xlu1 %v2114_v37, %s1889_s8  ;;  %v1868_v12 = vpop.eup %1867 }
 0x136   : > { %v653_v13 = vmul.f32 %v1868_v12, %v569_v49 }
 0x138   : > { %v2197_v16 = vmul.f32 %v2051_v9, %v653_v13 }
 0x139   : > { %764 = vrot.lane.b32.xlu0 %v2127_v47, %s1894_s13  ;;  %702 = vrot.lane.b32.xlu1 %v2114_v37, %s1891_s10 }
 0x13a   : > { %v1870_v19 = vpop.eup %1869 }
 0x13b   : > { %v1872_v22 = vpop.eup %1871  ;;  %v620_v23 = vadd.f32 1.0, %v1870_v19 }
 0x13c   : > { %v654_v29 = vmul.f32 %v1872_v22, %v570_v59  ;;  %v1874_v28 = vpop.eup %1873 }
 0x13d   : > { %1179 = vrot.lane.b32.xlu0 %v2144_v56, %s1889_s8  ;;  %894 = vrot.lane.b32.xlu1 %v2144_v56, %s1890_s9  ;;  %1875 = vrcp.f32 %v620_v23  ;;  %v621_v34 = vadd.f32 1.0, %v1874_v28 }
 0x13e   : > { %v2218_v32 = vmul.f32 %v2107_v41, %v654_v29 }
 0x13f   : > { %1877 = vrcp.f32 %v621_v34 }
 0x141   : > { %722 = vrot.lane.b32.xlu0 %v2144_v56, %s1891_s10  ;;  %837 = vrot.lane.b32.xlu1 %v2144_v56, %s1892_s11 }
 0x145   : > { %1163 = vrot.lane.b32.xlu0 %v2127_v47, %s1889_s8  ;;  %780 = vrot.lane.b32.xlu1 %v2144_v56, %s1894_s13 }
 0x149   : > { %1122 = vrot.lane.b32.xlu0 %v2144_v56, %s1893_s12  ;;  %706 = vrot.lane.b32.xlu1 %v2127_v47, %s1891_s10 }
 0x14a   : > { %v1876_v38 = vpop.eup %1875 }
 0x14b   : > { %v656_v39 = vmul.f32 %v1876_v38, %v572_v6 }
 0x14c   : > { %v1878_v49 = vpop.eup %1877 }
 0x14d   : > { %888 = vrot.lane.b32.xlu0 %v2165_v33, %s1890_s9  ;;  %1106 = vrot.lane.b32.xlu1 %v2127_v47, %s1893_s12  ;;  %v2259_v42 = vmul.f32 %v2051_v9, %v656_v39  ;;  %v657_v50 = vmul.f32 %v1878_v49, %v573_v18 }
 0x14f   : > { %v2290_v53 = vmul.f32 %v2107_v41, %v657_v50 }
 0x151   : > { %880 = vrot.lane.b32.xlu0 %v2172_v3, %s1890_s9  ;;  %1065 = vrot.lane.b32.xlu1 %v2144_v56, %s1895_s14 }
 0x155   : > { %831 = vrot.lane.b32.xlu0 %v2165_v33, %s1892_s11  ;;  %1165 = vrot.lane.b32.xlu1 %v2172_v3, %s1889_s8 }
 0x159   : > { %823 = vrot.lane.b32.xlu0 %v2172_v3, %s1892_s11  ;;  %708 = vrot.lane.b32.xlu1 %v2172_v3, %s1891_s10 }
 0x15d   : > { %774 = vrot.lane.b32.xlu0 %v2165_v33, %s1894_s13  ;;  %1108 = vrot.lane.b32.xlu1 %v2172_v3, %s1893_s12 }
 0x161   : > { %766 = vrot.lane.b32.xlu0 %v2172_v3, %s1894_s13  ;;  %1051 = vrot.lane.b32.xlu1 %v2172_v3, %s1895_s14 }
 0x165   : > { %1173 = vrot.lane.b32.xlu0 %v2165_v33, %s1889_s8  ;;  %884 = vrot.lane.b32.xlu1 %v2197_v16, %s1890_s9 }
 0x169   : > { %716 = vrot.lane.b32.xlu0 %v2165_v33, %s1891_s10  ;;  %827 = vrot.lane.b32.xlu1 %v2197_v16, %s1892_s11 }
 0x16d   : > { %1116 = vrot.lane.b32.xlu0 %v2165_v33, %s1893_s12  ;;  %770 = vrot.lane.b32.xlu1 %v2197_v16, %s1894_s13 }
 0x171   : > { %1059 = vrot.lane.b32.xlu0 %v2165_v33, %s1895_s14  ;;  %712 = vrot.lane.b32.xlu1 %v2197_v16, %s1891_s10 }
 0x175   : > { %1169 = vrot.lane.b32.xlu0 %v2197_v16, %s1889_s8  ;;  %886 = vrot.lane.b32.xlu1 %v2218_v32, %s1890_s9 }
 0x177   : > { %v2224_v24 = vpop.permute.xlu0 %1167  ;;  %v2226_v25 = vpop.permute.xlu1 %882 }
 0x178   : > { %1207 = vst.msk [vmem:[#allocation2 + $0x328] sm:$0xff] %vm747_vm2, %v2224_v24  ;;  %922 = vst.msk [vmem:[#allocation2 + $0x148] sm:$0xff] %vm747_vm2, %v2226_v25 }
 0x179   : > { %1112 = vrot.lane.b32.xlu0 %v2197_v16, %s1893_s12  ;;  %829 = vrot.lane.b32.xlu1 %v2218_v32, %s1892_s11 }
 0x17b   : > { %v2236_v26 = vpop.permute.xlu0 %710  ;;  %v873_v27 = vpop.permute.xlu1 %872 }
 0x17c   : > { %751 = vst.msk [vmem:[#allocation2 + $0x28] sm:$0xff] %vm747_vm2, %v2236_v26 }
 0x17d   : > { %1055 = vrot.lane.b32.xlu0 %v2197_v16, %s1895_s14  ;;  %772 = vrot.lane.b32.xlu1 %v2218_v32, %s1894_s13 }
 0x17f   : > { %v2244_v35 = vpop.permute.xlu0 %1157  ;;  %v2246_v36 = vpop.permute.xlu1 %825 }
 0x180   : > { %865 = vst.msk [vmem:[#allocation2 + $0xe8] sm:$0xff] %vm747_vm2, %v2246_v36 }
 0x181   : > { %1114 = vrot.lane.b32.xlu0 %v2218_v32, %s1893_s12  ;;  %1171 = vrot.lane.b32.xlu1 %v2218_v32, %s1889_s8 }
 0x183   : > { %v1101_v30 = vpop.permute.xlu0 %1100  ;;  %v816_v40 = vpop.permute.xlu1 %815 }
 0x185   : > { %1057 = vrot.lane.b32.xlu0 %v2218_v32, %s1895_s14  ;;  %714 = vrot.lane.b32.xlu1 %v2218_v32, %s1891_s10 }
 0x187   : > { %v877_v43 = vpop.permute.xlu0 %876  ;;  %v2261_v44 = vpop.permute.xlu1 %768 }
 0x188   : > { %919 = vst.msk [vmem:[#allocation2 + $0x130] sm:$0xff] %vm747_vm2, %v877_v43  ;;  %808 = vst.msk [vmem:[#allocation2 + $0x88] sm:$0xff] %vm747_vm2, %v2261_v44 }
 0x189   : > { %890 = vrot.lane.b32.xlu0 %v2259_v42, %s1890_s9  ;;  %718 = vrot.lane.b32.xlu1 %v2259_v42, %s1891_s10 }
 0x18b   : > { %v820_v45 = vpop.permute.xlu0 %819  ;;  %v759_v46 = vpop.permute.xlu1 %758 }
 0x18c   : > { %862 = vst.msk [vmem:[#allocation2 + $0xd0] sm:$0xff] %vm747_vm2, %v820_v45 }
 0x18d   : > { %833 = vrot.lane.b32.xlu0 %v2259_v42, %s1892_s11  ;;  %1118 = vrot.lane.b32.xlu1 %v2259_v42, %s1893_s12 }
 0x18f   : > { %v763_v9 = vpop.permute.xlu0 %762  ;;  %v701_v48 = vpop.permute.xlu1 %700 }
 0x190   : > { %805 = vst.msk [vmem:[#allocation2 + $0x70] sm:$0xff] %vm747_vm2, %v763_v9 }
 0x191   : > { %776 = vrot.lane.b32.xlu0 %v2259_v42, %s1894_s13  ;;  %1061 = vrot.lane.b32.xlu1 %v2259_v42, %s1895_s14 }
 0x193   : > { %v1162_v51 = vpop.permute.xlu0 %1161  ;;  %v2280_v52 = vpop.permute.xlu1 %1110 }
 0x194   : > { %1204 = vst.msk [vmem:[#allocation2 + $0x310] sm:$0xff] %vm747_vm2, %v1162_v51  ;;  %1150 = vst.msk [vmem:[#allocation2 + $0x2c8] sm:$0xff] %vm747_vm2, %v2280_v52 }
 0x195   : > { %1175 = vrot.lane.b32.xlu0 %v2259_v42, %s1889_s8  ;;  %1049 = vrot.lane.b32.xlu1 %v2127_v47, %s1895_s14 }
 0x197   : > { %v705_v54 = vpop.permute.xlu0 %704  ;;  %v2292_v55 = vpop.permute.xlu1 %1053 }
 0x198   : > { %748 = vst.msk [vmem:[#allocation2 + $0x10] sm:$0xff] %vm747_vm2, %v705_v54  ;;  %1093 = vst.msk [vmem:[#allocation2 + $0x268] sm:$0xff] %vm747_vm2, %v2292_v55 }
 0x199   : > { %892 = vrot.lane.b32.xlu0 %v2290_v53, %s1890_s9  ;;  %1008 = vrot.lane.b32.xlu1 %v2144_v56, %s1896_s15 }
 0x19b   : > { %v1105_v57 = vpop.permute.xlu0 %1104  ;;  %v875_v58 = vpop.permute.xlu1 %874 }
 0x19c   : > { %1147 = vst.msk [vmem:[#allocation2 + $0x2b0] sm:$0xff] %vm747_vm2, %v1105_v57  ;;  %v2303_v41 = vsel %vm896_vm3, %v873_v27, %v875_v58  ;;  %v2306_v59 = vsel %vm896_vm3, %v875_v58, %v877_v43 }
 0x19d   : > { %1047 = vrot.lane.b32.xlu0 %v2082_v21, %s1895_s14  ;;  %1004 = vrot.lane.b32.xlu1 %v2259_v42, %s1896_s15 }
 0x19f   : > { %v1103_v60 = vpop.permute.xlu0 %1102  ;;  %v818_v61 = vpop.permute.xlu1 %817 }
 0x1a0   : > { %v2313_v62 = vsel %vm1124_vm4, %v1101_v30, %v1103_v60  ;;  %v2316_v63 = vsel %vm1124_vm4, %v1103_v60, %v1105_v57  ;;  %v2319_v0 = vsel %vm839_vm5, %v816_v40, %v818_v61  ;;  %v2322_v31 = vsel %vm839_vm5, %v818_v61, %v820_v45 }
 0x1a1   : > { %835 = vrot.lane.b32.xlu0 %v2290_v53, %s1892_s11  ;;  %996 = vrot.lane.b32.xlu1 %v2054_v10, %s1896_s15 }
 0x1a3   : > { %v879_v2 = vpop.permute.xlu0 %878  ;;  %v761_v5 = vpop.permute.xlu1 %760 }
 0x1a4   : > { %v2329_v4 = vsel %vm782_vm6, %v759_v46, %v761_v5  ;;  %v2332_v6 = vsel %vm782_vm6, %v761_v5, %v763_v9 }
 0x1a5   : > { %1045 = vrot.lane.b32.xlu0 %v2114_v37, %s1895_s14  ;;  %994 = vrot.lane.b32.xlu1 %v2172_v3, %s1896_s15 }
 0x1a7   : > { %v822_v7 = vpop.permute.xlu0 %821  ;;  %v1160_v8 = vpop.permute.xlu1 %1159 }
 0x1a8   : > { %v2340_v11 = vsel %vm1181_vm7, %v2244_v35, %v1160_v8  ;;  %v2343_v12 = vsel %vm1181_vm7, %v1160_v8, %v1162_v51 }
 0x1a9   : > { %778 = vrot.lane.b32.xlu0 %v2290_v53, %s1894_s13  ;;  %992 = vrot.lane.b32.xlu1 %v2127_v47, %s1896_s15 }
 0x1ab   : > { %v2349_v13 = vpop.permute.xlu0 %764  ;;  %v703_v15 = vpop.permute.xlu1 %702 }
 0x1ac   : > { %v2352_v17 = vsel %vm724_vm8, %v701_v48, %v703_v15  ;;  %v2355_v18 = vsel %vm724_vm8, %v703_v15, %v705_v54 }
 0x1ad   : > { %1043 = vrot.lane.b32.xlu0 %v2063_v14, %s1895_s14  ;;  %1177 = vrot.lane.b32.xlu1 %v2290_v53, %s1889_s8 }
 0x1af   : > { %v2361_v19 = vpop.permute.xlu0 %1179  ;;  %v2363_v20 = vpop.permute.xlu1 %894 }
 0x1b0   : > { %1213 = vst.msk [vmem:[#allocation2 + $0x358] sm:$0xff] %vm747_vm2, %v2361_v19  ;;  %928 = vst.msk [vmem:[#allocation2 + $0x178] sm:$0xff] %vm747_vm2, %v2363_v20 }
 0x1b1   : > { %1002 = vrot.lane.b32.xlu0 %v2165_v33, %s1896_s15  ;;  %720 = vrot.lane.b32.xlu1 %v2290_v53, %s1891_s10 }
 0x1b3   : > { %v2373_v22 = vpop.permute.xlu0 %722  ;;  %v2375_v29 = vpop.permute.xlu1 %837 }
 0x1b4   : > { %757 = vst.msk [vmem:[#allocation2 + $0x58] sm:$0xff] %vm747_vm2, %v2373_v22  ;;  %871 = vst.msk [vmem:[#allocation2 + $0x118] sm:$0xff] %vm747_vm2, %v2375_v29 }
 0x1b5   : > { %1000 = vrot.lane.b32.xlu0 %v2218_v32, %s1896_s15  ;;  %951 = vrot.lane.b32.xlu1 %v2144_v56, %s1897_s16 }
 0x1b7   : > { %v1164_v23 = vpop.permute.xlu0 %1163  ;;  %v2385_v27 = vpop.permute.xlu1 %780 }
 0x1b8   : > { %814 = vst.msk [vmem:[#allocation2 + $0xb8] sm:$0xff] %vm747_vm2, %v2385_v27 }
 0x1b9   : > { %998 = vrot.lane.b32.xlu0 %v2197_v16, %s1896_s15  ;;  %1120 = vrot.lane.b32.xlu1 %v2290_v53, %s1893_s12 }
 0x1bb   : > { %v2393_v28 = vpop.permute.xlu0 %1122  ;;  %v707_v34 = vpop.permute.xlu1 %706 }
 0x1bc   : > { %1156 = vst.msk [vmem:[#allocation2 + $0x2f8] sm:$0xff] %vm747_vm2, %v2393_v28 }
 0x1bd   : > { %990 = vrot.lane.b32.xlu0 %v2082_v21, %s1896_s15  ;;  %947 = vrot.lane.b32.xlu1 %v2259_v42, %s1897_s16 }
 0x1bf   : > { %v2401_v56 = vpop.permute.xlu0 %888  ;;  %v1107_v35 = vpop.permute.xlu1 %1106 }
 0x1c0   : > { %925 = vst.msk [vmem:[#allocation2 + $0x160] sm:$0xff] %vm747_vm2, %v2401_v56 }
 0x1c1   : > { %988 = vrot.lane.b32.xlu0 %v2114_v37, %s1896_s15  ;;  %1063 = vrot.lane.b32.xlu1 %v2290_v53, %s1895_s14 }
 0x1c3   : > { %v881_v38 = vpop.permute.xlu0 %880  ;;  %v2409_v39 = vpop.permute.xlu1 %1065 }
 0x1c4   : > { %v2412_v30 = vsel %vm896_vm3, %v879_v2, %v881_v38  ;;  %v2416_v40 = vsel %vm896_vm3, %v881_v38, %v2226_v25  ;;  %1099 = vst.msk [vmem:[#allocation2 + $0x298] sm:$0xff] %vm747_vm2, %v2409_v39 }
 0x1c5   : > { %986 = vrot.lane.b32.xlu0 %v2063_v14, %s1896_s15  ;;  %939 = vrot.lane.b32.xlu1 %v2054_v10, %s1897_s16 }
 0x1c7   : > { %v832_v42 = vpop.permute.xlu0 %831  ;;  %v1166_v43 = vpop.permute.xlu1 %1165 }
 0x1c8   : > { %868 = vst.msk [vmem:[#allocation2 + $0x100] sm:$0xff] %vm747_vm2, %v832_v42  ;;  %v2426_v45 = vsel %vm1181_vm7, %v1164_v23, %v1166_v43  ;;  %v2430_v25 = vsel %vm1181_vm7, %v1166_v43, %v2224_v24 }
 0x1c9   : > { %945 = vrot.lane.b32.xlu0 %v2165_v33, %s1897_s16  ;;  %1006 = vrot.lane.b32.xlu1 %v2290_v53, %s1896_s15  ;;  %v2453_v33 = vld [vmem:[%s2698_s5] sm:$0xff] }
 0x1cb   : > { %v824_v46 = vpop.permute.xlu0 %823  ;;  %v709_v9 = vpop.permute.xlu1 %708 }
 0x1cc   : > { %v2437_v10 = vsel %vm839_vm5, %v822_v7, %v824_v46  ;;  %v2441_v48 = vsel %vm839_vm5, %v824_v46, %v2246_v36  ;;  %v2444_v49 = vsel %vm724_vm8, %v707_v34, %v709_v9  ;;  %v2448_v24 = vsel %vm724_vm8, %v709_v9, %v2236_v26 }
 0x1cd   : > { %943 = vrot.lane.b32.xlu0 %v2218_v32, %s1897_s16  ;;  %937 = vrot.lane.b32.xlu1 %v2172_v3, %s1897_s16  ;;  %v2461_v36 = vcombine.high %v2453_v33, %v2453_v33 }
 0x1cf   : > { %v775_v50 = vpop.permute.xlu0 %774  ;;  %v1109_v51 = vpop.permute.xlu1 %1108  ;;  %1401 = vmatprep.mubr.f32.mxu0 %v2461_v36 }
 0x1d0   : > { %811 = vst.msk [vmem:[#allocation2 + $0xa0] sm:$0xff] %vm747_vm2, %v775_v50  ;;  %v2466_v26 = vsel %vm1124_vm4, %v1107_v35, %v1109_v51  ;;  %v2470_v54 = vsel %vm1124_vm4, %v1109_v51, %v2280_v52 }
 0x1d1   : > { %941 = vrot.lane.b32.xlu0 %v2197_v16, %s1897_s16  ;;  %949 = vrot.lane.b32.xlu1 %v2290_v53, %s1897_s16 }
 0x1d3   : > { %v767_v3 = vpop.permute.xlu0 %766  ;;  %v1052_v32 = vpop.permute.xlu1 %1051 }
 0x1d4   : > { %v2478_v57 = vsel %vm782_vm6, %v2349_v13, %v767_v3  ;;  %v2482_v58 = vsel %vm782_vm6, %v767_v3, %v2261_v44  ;;  %v2486_v52 = vsel %vm1067_vm9, %v1052_v32, %v2292_v55  ;;  %v1324_v44 = vld [vmem:[%s2699_s6] sm:$0xf] }
 0x1d5   : > { %933 = vrot.lane.b32.xlu0 %v2082_v21, %s1897_s16  ;;  %935 = vrot.lane.b32.xlu1 %v2127_v47, %s1897_s16 }
 0x1d7   : > { %v1174_v16 = vpop.permute.xlu0 %1173  ;;  %v885_v53 = vpop.permute.xlu1 %884 }
 0x1d8   : > { %1210 = vst.msk [vmem:[#allocation2 + $0x340] sm:$0xff] %vm747_vm2, %v1174_v16 }
 0x1d9   : > { %931 = vrot.lane.b32.xlu0 %v2114_v37, %s1897_s16  ;;  %929 = vrot.lane.b32.xlu1 %v2063_v14, %s1897_s16 }
 0x1db   : > { %v717_v55 = vpop.permute.xlu0 %716  ;;  %v828_v60 = vpop.permute.xlu1 %827 }
 0x1dc   : > { %754 = vst.msk [vmem:[#allocation2 + $0x40] sm:$0xff] %vm747_vm2, %v717_v55 }
 0x1dd   : > { %1327 = vperm.xlu0 %1828, %v1324_v44  }
 0x1df   : > { %v1117_v21 = vpop.permute.xlu0 %1116  ;;  %v771_v47 = vpop.permute.xlu1 %770 }
 0x1e0   : > { %1153 = vst.msk [vmem:[#allocation2 + $0x2e0] sm:$0xff] %vm747_vm2, %v1117_v21 }
 0x1e3   : > { %v1060_v61 = vpop.permute.xlu0 %1059  ;;  %v713_v2 = vpop.permute.xlu1 %712 }
 0x1e4   : > { %1096 = vst.msk [vmem:[#allocation2 + $0x280] sm:$0xff] %vm747_vm2, %v1060_v61 }
 0x1e7   : > { %v1170_v37 = vpop.permute.xlu0 %1169  ;;  %v887_v5 = vpop.permute.xlu1 %886 }
 0x1e8   : > { %v901_v14 = vsel %vm896_vm3, %v885_v53, %v887_v5  ;;  %v902_v7 = vsel %vm896_vm3, %v887_v5, %v2401_v56 }
 0x1eb   : > { %v1113_v8 = vpop.permute.xlu0 %1112  ;;  %v830_v13 = vpop.permute.xlu1 %829 }
 0x1ec   : > { %v844_v15 = vsel %vm839_vm5, %v828_v60, %v830_v13  ;;  %v845_v23 = vsel %vm839_vm5, %v830_v13, %v832_v42 }
 0x1ef   : > { %v1056_v34 = vpop.permute.xlu0 %1055  ;;  %v773_v35 = vpop.permute.xlu1 %772 }
 0x1f0   : > { %v2509_v38 = vsel %vm782_vm6, %v771_v47, %v773_v35  ;;  %v2512_v43 = vsel %vm782_vm6, %v773_v35, %v775_v50 }
 0x1f3   : > { %v1115_v46 = vpop.permute.xlu0 %1114  ;;  %v1172_v9 = vpop.permute.xlu1 %1171 }
 0x1f4   : > { %v2515_v51 = vsel %vm1124_vm4, %v1113_v8, %v1115_v46  ;;  %v2518_v56 = vsel %vm1124_vm4, %v1115_v46, %v1117_v21  ;;  %v2521_v3 = vsel %vm1181_vm7, %v1170_v37, %v1172_v9  ;;  %v2524_v42 = vsel %vm1181_vm7, %v1172_v9, %v1174_v16 }
 0x1f7   : > { %v1058_v53 = vpop.permute.xlu0 %1057  ;;  %v715_v44 = vpop.permute.xlu1 %714 }
 0x1f8   : > { %v2527_v60 = vsel %vm1067_vm9, %v1056_v34, %v1058_v53  ;;  %v2530_v50 = vsel %vm1067_vm9, %v1058_v53, %v1060_v61  ;;  %v2533_v47 = vsel %vm724_vm8, %v713_v2, %v715_v44  ;;  %v2536_v21 = vsel %vm724_vm8, %v715_v44, %v717_v55 }
 0x1fb   : > { %v891_v5 = vpop.permute.xlu0 %890  ;;  %v2538_v37 = vpop.permute.xlu1 %718 }
 0x1ff   : > { %v834_v8 = vpop.permute.xlu0 %833  ;;  %v2540_v16 = vpop.permute.xlu1 %1118 }
 0x203   : > { %v777_v13 = vpop.permute.xlu0 %776  ;;  %v2542_v35 = vpop.permute.xlu1 %1061 }
 0x207   : > { %v1176_v34 = vpop.permute.xlu0 %1175  ;;  %v1050_v46 = vpop.permute.xlu1 %1049 }
 0x208   : > { %v2545_v61 = vsel %vm1067_vm9, %v1050_v46, %v1052_v32 }
 0x20b   : > { %v893_v9 = vpop.permute.xlu0 %892  ;;  %v2547_v2 = vpop.permute.xlu1 %1008 }
 0x20c   : > { %v903_v55 = vsel %vm896_vm3, %v891_v5, %v893_v9  ;;  %v904_v53 = vsel %vm896_vm3, %v893_v9, %v2363_v20  ;;  %1042 = vst.msk [vmem:[#allocation2 + $0x238] sm:$0xff] %vm747_vm2, %v2547_v2 }
 0x20d   : > { %1337 = vmatprep.subr.mxu0 %v904_v53  ;;  %v1293_v53 = vld [vmem:[#allocation2 + $0x268] sm:$0xff] }
 0x20e   : > { %1338 = vmatpush1.msra.mxu0 %v903_v55 }
 0x20f   : > { %v1048_v44 = vpop.permute.xlu0 %1047  ;;  %v2554_v1 = vpop.permute.xlu1 %1004  ;;  %1339 = vmatprep.subr.mxu0 %v902_v7 }
 0x210   : > { %1090 = vst.msk [vmem:[#allocation2 + $0x250] sm:$0xff] %vm747_vm2, %v1048_v44  ;;  %1340 = vmatpush1.msra.mxu0 %v901_v14 }
 0x211   : > { %1341 = vmatprep.subr.mxu0 %v2416_v40 }
 0x212   : > { %1342 = vmatpush1.msra.mxu0 %v2412_v30 }
 0x213   : > { %v836_v32 = vpop.permute.xlu0 %835  ;;  %v997_v5 = vpop.permute.xlu1 %996  ;;  %1343 = vmatprep.subr.mxu0 %v2306_v59 }
 0x214   : > { %v846_v20 = vsel %vm839_vm5, %v834_v8, %v836_v32  ;;  %v847_v46 = vsel %vm839_vm5, %v836_v32, %v2375_v29  ;;  %1036 = vst.msk [vmem:[#allocation2 + $0x208] sm:$0xff] %vm747_vm2, %v997_v5  ;;  %1344 = vmatpush1.msra.mxu0 %v2303_v41 }
 0x215   : > { %1345 = vmatprep.subr.mxu0 %v847_v46 }
 0x216   : > { %1346 = vmatpush1.msra.mxu0 %v846_v20  ;;  %v1239_v20 = vld [vmem:[#allocation2 + $0xb8] sm:$0xff] }
 0x217   : > { %v1046_v14 = vpop.permute.xlu0 %1045  ;;  %v995_v40 = vpop.permute.xlu1 %994  ;;  %1347 = vmatprep.subr.mxu0 %v845_v23 }
 0x218   : > { %v2566_v30 = vsel %vm1067_vm9, %v1046_v14, %v1048_v44  ;;  %v2569_v59 = vsel %vm1010_vm10, %v995_v40, %v997_v5  ;;  %1348 = vmatpush1.msra.mxu0 %v844_v15  ;;  %v1290_v5 = vld [vmem:[#allocation2 + $0x250] sm:$0xff] }
 0x219   : > { %1349 = vmatprep.subr.mxu0 %v2441_v48 }
 0x21a   : > { %1350 = vmatpush1.msra.mxu0 %v2437_v10 }
 0x21b   : > { %v779_v29 = vpop.permute.xlu0 %778  ;;  %v993_v7 = vpop.permute.xlu1 %992  ;;  %1351 = vmatprep.subr.mxu0 %v2322_v31 }
 0x21c   : > { %v789_v41 = vsel %vm782_vm6, %v777_v13, %v779_v29  ;;  %v790_v23 = vsel %vm782_vm6, %v779_v29, %v2385_v27  ;;  %v2578_v8 = vsel %vm1010_vm10, %v993_v7, %v995_v40  ;;  %1352 = vmatpush1.msra.mxu0 %v2319_v0 }
 0x21d   : > { %1353 = vmatprep.subr.mxu0 %v790_v23  ;;  %v1230_v23 = vld [vmem:[#allocation2 + $0x70] sm:$0xff] }
 0x21e   : > { %1354 = vmatpush1.msra.mxu0 %v789_v41 }
 0x21f   : > { %v1044_v15 = vpop.permute.xlu0 %1043  ;;  %v1178_v48 = vpop.permute.xlu1 %1177  ;;  %1355 = vmatprep.subr.mxu0 %v2512_v43 }
 0x220   : > { %v2583_v10 = vsel %vm1067_vm9, %v1044_v15, %v1046_v14  ;;  %v1188_v31 = vsel %vm1181_vm7, %v1176_v34, %v1178_v48  ;;  %v1189_v13 = vsel %vm1181_vm7, %v1178_v48, %v2361_v19  ;;  %1356 = vmatpush1.msra.mxu0 %v2509_v38  ;;  %v1308_v38 = vld [vmem:[#allocation2 + $0x2e0] sm:$0xff]  ;;  %v1227_v48 = vld [vmem:[#allocation2 + $0x58] sm:$0xff] }
 0x221   : > { %1357 = vmatprep.subr.mxu0 %v2482_v58  ;;  %1432 = vmatprep.subr.mxu1 %v1189_v13 }
 0x222   : > { %1358 = vmatpush1.msra.mxu0 %v2478_v57  ;;  %1433 = vmatpush1.msra.mxu1 %v1188_v31 }
 0x223   : > { %v1003_v0 = vpop.permute.xlu0 %1002  ;;  %v721_v27 = vpop.permute.xlu1 %720  ;;  %1359 = vmatprep.subr.mxu0 %v2332_v6  ;;  %1434 = vmatprep.subr.mxu1 %v2524_v42  ;;  %v1305_v42 = vld [vmem:[#allocation2 + $0x2c8] sm:$0xff] }
 0x224   : > { %1039 = vst.msk [vmem:[#allocation2 + $0x220] sm:$0xff] %vm747_vm2, %v1003_v0  ;;  %v731_v43 = vsel %vm724_vm8, %v2538_v37, %v721_v27  ;;  %v732_v19 = vsel %vm724_vm8, %v721_v27, %v2373_v22  ;;  %1360 = vmatpush1.msra.mxu0 %v2329_v4  ;;  %1435 = vmatpush1.msra.mxu1 %v2521_v3  ;;  %v2609_v22 = vld [vmem:[%s2698_s5 + $0x8] sm:$0xf]  ;;  %v1302_v37 = vld [vmem:[#allocation2 + $0x2b0] sm:$0xff] }
 0x225   : > { %1361 = vmatprep.subr.mxu0 %v732_v19  ;;  %1436 = vmatprep.subr.mxu1 %v2430_v25  ;;  %v1221_v19 = vld [vmem:[#allocation2 + $0x28] sm:$0xff] }
 0x226   : > { %1362 = vmatpush1.msra.mxu0 %v731_v43  ;;  %1437 = vmatpush1.msra.mxu1 %v2426_v45  ;;  %v1311_v45 = vld [vmem:[#allocation2 + $0x2f8] sm:$0xff] }
 0x227   : > { %v1001_v6 = vpop.permute.xlu0 %1000  ;;  %v2602_v57 = vpop.permute.xlu1 %951  ;;  %1363 = vmatprep.subr.mxu0 %v2536_v21  ;;  %1438 = vmatprep.subr.mxu1 %v2343_v12  ;;  %v1263_v12 = vld [vmem:[#allocation2 + $0x178] sm:$0xff] }
 0x228   : > { %v2612_v4 = vsel %vm1010_vm10, %v1001_v6, %v1003_v0  ;;  %985 = vst.msk [vmem:[#allocation2 + $0x1d8] sm:$0xff] %vm747_vm2, %v2602_v57  ;;  %1364 = vmatpush1.msra.mxu0 %v2533_v47  ;;  %1439 = vmatpush1.msra.mxu1 %v2340_v11 }
 0x229   : > { %1365 = vmatprep.subr.mxu0 %v2448_v24  ;;  %1739 = vmatprep.subr.mxu1 %v1311_v45 }
 0x22a   : > { %1366 = vmatpush1.msra.mxu0 %v2444_v49  ;;  %1725 = vmatmul.mubr.msk.f32.vlgmr.msra.gmra.mxu1 %vm1334_vm11, %v2609_v22  ;;  %v1260_v49 = vld [vmem:[#allocation2 + $0x160] sm:$0xff] }
 0x22b   : > { %v999_v25 = vpop.permute.xlu0 %998  ;;  %v1121_v58 = vpop.permute.xlu1 %1120  ;;  %1740 = vmatpush3.msra.mxu1 %v1263_v12  ;;  %1367 = vmatprep.subr.mxu0 %v2355_v18  ;;  %v1257_v18 = vld [vmem:[#allocation2 + $0x148] sm:$0xff] }
 0x22c   : > { %v2624_v3 = vsel %vm1010_vm10, %v999_v25, %v1001_v6  ;;  %v1131_v11 = vsel %vm1124_vm4, %v2540_v16, %v1121_v58  ;;  %v1132_v24 = vsel %vm1124_vm4, %v1121_v58, %v2393_v28  ;;  %1741 = vmatprep.subr.mxu1 %v1308_v38  ;;  %1368 = vmatpush1.msra.mxu0 %v2352_v17  ;;  %v1254_v17 = vld [vmem:[#allocation2 + $0x130] sm:$0xff]  ;;  %v1299_v28 = vld [vmem:[#allocation2 + $0x298] sm:$0xff] }
 0x22d   : > { %1742 = vmatpush3.msra.mxu1 %v1260_v49  ;;  %1369 = vmatprep.subr.mxu0 %v1132_v24  ;;  %v1251_v16 = vld [vmem:[#allocation2 + $0x118] sm:$0xff]  ;;  %v1320_v24 = vld [vmem:[#allocation2 + $0x340] sm:$0xff]  ;;  %v1317_v49 = vld [vmem:[#allocation2 + $0x328] sm:$0xff] }
 0x22e   : > { %1743 = vmatprep.subr.mxu1 %v1305_v42  ;;  %1370 = vmatpush2.msra.mxu0 %v1131_v11  ;;  %v2703_v11 = vmov 0.0   ;;  %v1314_v42 = vld [vmem:[#allocation2 + $0x310] sm:$0xff] }
 0x22f   : > { %v991_v47 = vpop.permute.xlu0 %990  ;;  %v2631_v21 = vpop.permute.xlu1 %947  ;;  %1744 = vmatpush3.msra.mxu1 %v1257_v18  ;;  %1371 = vmatprep.subr.mxu0 %v2518_v56  ;;  %v1296_v56 = vld [vmem:[#allocation2 + $0x280] sm:$0xff]  ;;  %v1275_v15 = vld [vmem:[#allocation2 + $0x1d8] sm:$0xff] }
 0x230   : > { %1033 = vst.msk [vmem:[#allocation2 + $0x1f0] sm:$0xff] %vm747_vm2, %v991_v47  ;;  %1745 = vmatprep.subr.mxu1 %v1302_v37  ;;  %1372 = vmatpush2.msra.mxu0 %v2515_v51 }
 0x231   : > { %1746 = vmatpush3.msra.mxu1 %v1254_v17  ;;  %1373 = vmatprep.subr.mxu0 %v2470_v54 }
 0x232   : > { %1747 = vmatprep.subr.mxu1 %v1299_v28  ;;  %1374 = vmatpush2.msra.mxu0 %v2466_v26  ;;  %v1248_v26 = vld [vmem:[#allocation2 + $0x100] sm:$0xff] }
 0x233   : > { %v989_v34 = vpop.permute.xlu0 %988  ;;  %v1064_v9 = vpop.permute.xlu1 %1063  ;;  %1748 = vmatpush3.msra.mxu1 %v1251_v16  ;;  %1375 = vmatprep.subr.mxu0 %v2316_v63  ;;  %v1245_v63 = vld [vmem:[#allocation2 + $0xe8] sm:$0xff] }
 0x234   : > { %v2640_v55 = vsel %vm1010_vm10, %v989_v34, %v991_v47  ;;  %v1074_v51 = vsel %vm1067_vm9, %v2542_v35, %v1064_v9  ;;  %v1075_v54 = vsel %vm1067_vm9, %v1064_v9, %v2409_v39  ;;  %1749 = vmatprep.subr.mxu1 %v1296_v56  ;;  %1376 = vmatpush2.msra.mxu0 %v2313_v62  ;;  %v1242_v62 = vld [vmem:[#allocation2 + $0xd0] sm:$0xff]  ;;  %v1287_v39 = vld [vmem:[#allocation2 + $0x238] sm:$0xff] }
 0x235   : > { %1750 = vmatpush3.msra.mxu1 %v1248_v26  ;;  %1377 = vmatprep.subr.mxu0 %v1075_v54 }
 0x236   : > { %1751 = vmatprep.subr.mxu1 %v1293_v53  ;;  %1378 = vmatpush2.msra.mxu0 %v1074_v51 }
 0x237   : > { %v987_v44 = vpop.permute.xlu0 %986  ;;  %v940_v32 = vpop.permute.xlu1 %939  ;;  %1752 = vmatpush3.msra.mxu1 %v1245_v63  ;;  %1379 = vmatprep.subr.mxu0 %v2530_v50  ;;  %v1284_v50 = vld [vmem:[#allocation2 + $0x220] sm:$0xff] }
 0x238   : > { %v1011_v35 = vsel %vm1010_vm10, %v987_v44, %v989_v34  ;;  %979 = vst.msk [vmem:[#allocation2 + $0x1a8] sm:$0xff] %vm747_vm2, %v940_v32  ;;  %1753 = vmatprep.subr.mxu1 %v1290_v5  ;;  %1380 = vmatpush2.msra.mxu0 %v2527_v60 }
 0x239   : > { %1754 = vmatpush3.msra.mxu1 %v1242_v62  ;;  %1381 = vmatprep.subr.mxu0 %v2486_v52  ;;  %v1236_v52 = vld [vmem:[#allocation2 + $0xa0] sm:$0xff] }
 0x23a   : > { %1755 = vmatprep.subr.mxu1 %v1287_v39  ;;  %1382 = vmatpush2.msra.mxu0 %v2545_v61  ;;  %v1281_v61 = vld [vmem:[#allocation2 + $0x208] sm:$0xff] }
 0x23b   : > { %v946_v46 = vpop.permute.xlu0 %945  ;;  %v1007_v14 = vpop.permute.xlu1 %1006  ;;  %1756 = vmatpush3.msra.mxu1 %v1239_v20  ;;  %1383 = vmatprep.subr.mxu0 %v2566_v30  ;;  %v1233_v30 = vld [vmem:[#allocation2 + $0x88] sm:$0xff] }
 0x23c   : > { %982 = vst.msk [vmem:[#allocation2 + $0x1c0] sm:$0xff] %vm747_vm2, %v946_v46  ;;  %v1017_v60 = vsel %vm1010_vm10, %v2554_v1, %v1007_v14  ;;  %v1018_v40 = vsel %vm1010_vm10, %v1007_v14, %v2547_v2  ;;  %1757 = vmatprep.subr.mxu1 %v1284_v50  ;;  %1384 = vmatpush2.msra.mxu0 %v2583_v10  ;;  %v1278_v1 = vld [vmem:[#allocation2 + $0x1f0] sm:$0xff] }
 0x23d   : > { %1758 = vmatpush3.msra.mxu1 %v1236_v52  ;;  %1385 = vmatprep.subr.mxu0 %v1018_v40 }
 0x23e   : > { %1759 = vmatprep.subr.mxu1 %v1281_v61  ;;  %1386 = vmatpush2.msra.mxu0 %v1017_v60 }
 0x23f   : > { %v944_v29 = vpop.permute.xlu0 %943  ;;  %v938_v7 = vpop.permute.xlu1 %937  ;;  %1760 = vmatpush3.msra.mxu1 %v1233_v30  ;;  %1387 = vmatprep.subr.mxu0 %v2612_v4 }
 0x240   : > { %v959_v41 = vsel %vm953_vm12, %v944_v29, %v946_v46  ;;  %v957_v2 = vsel %vm953_vm12, %v938_v7, %v940_v32  ;;  %1761 = vmatprep.subr.mxu1 %v1278_v1  ;;  %1388 = vmatpush2.msra.mxu0 %v2624_v3  ;;  %v1218_v3 = vld [vmem:[#allocation2 + $0x10] sm:$0xff] }
 0x241   : > { %1762 = vmatpush3.msra.mxu1 %v1230_v23  ;;  %1389 = vmatprep.subr.mxu0 %v2569_v59  ;;  %v1224_v59 = vld [vmem:[#allocation2 + $0x40] sm:$0xff] }
 0x242   : > { %1763 = vmatprep.subr.mxu1 %v1275_v15  ;;  %1390 = vmatpush2.msra.mxu0 %v2578_v8  ;;  %v1269_v8 = vld [vmem:[#allocation2 + $0x1a8] sm:$0xff] }
 0x243   : > { %v942_v10 = vpop.permute.xlu0 %941  ;;  %v950_v31 = vpop.permute.xlu1 %949  ;;  %1764 = vmatpush3.msra.mxu1 %v1227_v48  ;;  %1391 = vmatprep.subr.mxu0 %v2640_v55  ;;  %v1272_v13 = vld [vmem:[#allocation2 + $0x1c0] sm:$0xff] }
 0x244   : > { %v958_v0 = vsel %vm953_vm12, %v942_v10, %v944_v29  ;;  %v960_v27 = vsel %vm953_vm12, %v2631_v21, %v950_v31  ;;  %v961_v43 = vsel %vm953_vm12, %v950_v31, %v2602_v57  ;;  %1765 = vmatprep.subr.mxu1 %v1272_v13  ;;  %1392 = vmatpush2.msra.mxu0 %v1011_v35 }
 0x245   : > { %1766 = vmatpush3.msra.mxu1 %v1224_v59  ;;  %1393 = vmatprep.subr.mxu0 %v961_v43 }
 0x246   : > { %1767 = vmatprep.subr.mxu1 %v1269_v8  ;;  %1394 = vmatpush2.msra.mxu0 %v960_v27 }
 0x247   : > { %v934_v6 = vpop.permute.xlu0 %933  ;;  %v936_v4 = vpop.permute.xlu1 %935  ;;  %1768 = vmatpush3.msra.mxu1 %v1221_v19  ;;  %1395 = vmatprep.subr.mxu0 %v959_v41 }
 0x248   : > { %976 = vst.msk [vmem:[#allocation2 + $0x190] sm:$0xff] %vm747_vm2, %v934_v6  ;;  %v956_v45 = vsel %vm953_vm12, %v936_v4, %v938_v7  ;;  %1396 = vmatpush2.msra.mxu0 %v958_v0  ;;  %1543 = vmatprep.mubr.f32.mxu1 %v2461_v36  ;;  %v1323_v36 = vld [vmem:[#allocation2 + $0x358] sm:$0xff] }
 0x249   : > { %1397 = vmatprep.subr.mxu0 %v957_v2 }
 0x24a   : > { %1398 = vmatpush2.msra.mxu0 %v956_v45 }
 0x24b   : > { %v932_v57 = vpop.permute.xlu0 %931  ;;  %v930_v12 = vpop.permute.xlu1 %929 }
 0x24c   : > { %v955_v25 = vsel %vm953_vm12, %v932_v57, %v934_v6  ;;  %v954_v58 = vsel %vm953_vm12, %v930_v12, %v932_v57 }
 0x24d   : > { %1399 = vmatprep.subr.mxu0 %v955_v25 }
 0x24e   : > { %1400 = vmatpush2.msra.mxu0 %v954_v58 }
 0x24f   : > { %v1266_v38 = vld [vmem:[#allocation2 + $0x190] sm:$0xff]  ;;  %1402 = vmatmul.mubr.f32.vlgmr.msra.gmra.mxu0 %v2453_v33 }
 0x250   : > { %1769 = vmatprep.subr.mxu1 %v1266_v38 }
 0x251   : > { %1770 = vmatpush3.msra.mxu1 %v1218_v3 }
 0x252   : > { %1544 = vmatmul.mubr.f32.vlgmr.msra.gmra.mxu1 %v2453_v33  ;;  %1795 = vmatprep.subr.mxu1 %v2703_v11 }
 0x253   : > { %1796 = vmatpush3.msra.mxu1 %v1323_v36  ;;  %1803 = vmatprep.mubr.msk.f32.mxu1 %vm1898_vm13, %v2703_v11 }
 0x254   : > { %1797 = vmatprep.subr.mxu1 %v2703_v11 }
 0x255   : > { %1798 = vmatpush3.msra.mxu1 %v1320_v24 }
 0x256   : > { %1799 = vmatprep.subr.mxu1 %v2703_v11 }
 0x257   : > { %1800 = vmatpush3.msra.mxu1 %v1317_v49 }
 0x258   : > { %1801 = vmatprep.subr.mxu1 %v2703_v11  ;;  %v1328_v18 = vpop.permute.xlu0 %1327 }
 0x259   : > { %1802 = vmatpush3.msra.mxu1 %v1314_v42 }
 0x25a   : > { %1804 = vmatmul.mubr.msk.f32.vlgmr.msra.gmra.mxu1 %vm1334_vm11, %v2609_v22 }
 0x2ea   : > { %v1474_v33 = vpop.f32.mrf.mxu1 }
 0x2ec   : > { %v1476_v21 = vpop.f32.mrf.mxu1 }
 0x30f   : > { %v1403_v47 = vpop.f32.mrf.mxu0 }
 0x310   : > { %v1404_v37 = vadd.f32 %v1403_v47, %v1328_v18 }
 0x311   : > { %v1405_v17 = vpop.f32.mrf.mxu0 }
 0x312   : > { %v1771_v28 = vpop.f32.mrf.mxu1  ;;  %v1406_v16 = vadd.f32 %v1405_v17, %v1328_v18  ;;  %v1475_v9 = vadd.f32 %v1474_v33, %v1404_v37 }
 0x314   : > { %v1772_v34 = vpop.f32.mrf.mxu1  ;;  %v1477_v56 = vadd.f32 %v1476_v21, %v1406_v16 }
 0x315   : > { %v1773_v55 = vadd.f32 %v1772_v34, %v1771_v28 }
 0x316   : > { %v1621_v51 = vcombine.low %v1475_v9, %v1477_v56 }
 0x317   : > { %v1546_v22 = vadd.f32 %v1773_v55, %v1328_v18 }
 0x318   : > { %1623 = vst [vmem:[%s298_s28] sm:$0xff] %v1621_v51 }
 0x31a   : > { %v1615_v54 = vpop.f32.mrf.mxu1 }
 0x31b   : > { %v1616_v26 = vadd.f32 %v1615_v54, %v1546_v22 }
 0x31c   : > { %v1805_v53 = vpop.f32.mrf.mxu1 }
 0x31d   : > { %1625 = vst.msk [vmem:[%s298_s28 + $0x8] sm:$0xf] %vm1624_vm14, %v1616_v26 }
 0x31e PF: > { %s17_s24 = sadd.s32 1, %s1885_s24  }
 0x31f   : > { %p14_p4 = scmp.ge.s32.totalorder %s17_s24, 4  }
 0x321   :  { %16 = sbr.rel (!%p14_p4) target bundleno = 1 (0x1), region = 81 }

</bundles_post_ra>
